<compile_context>
chip_gen: v7x
topology: tpu7x:2x2x1
jax: 0.10.0
libtpu: 0.0.40
codegen_flags: <defaults>
</compile_context>

<pallas_src>
import functools

import jax
import jax.numpy as jnp
from jax.experimental import pallas as pl
from jax.experimental.pallas import tpu as pltpu


_VMEM_LIMIT_BYTES = 32 * 1024 * 1024  # <= scoped/physical VMEM on v5e/v6e/v7x


def _compiler_params(n_grid_axes):
    return pltpu.CompilerParams(
        dimension_semantics=("parallel",) * n_grid_axes,
        vmem_limit_bytes=_VMEM_LIMIT_BYTES,
    )


def _pick_lane_tile(extent, max_tile=2048):
    """Largest lane tile (multiple of 128, <= max_tile) dividing `extent`.

    Falls back to the full extent when it is not a multiple of 128 (a block
    equal to the full dim is always legal)."""
    if extent % 128 != 0:
        return extent
    t = max_tile
    while t > 128 and extent % t != 0:
        t //= 2
    return min(t, extent)


# ----------------------------- Pallas kernels ------------------------------ #

def _conv1x1_add_kernel(x_ref, w_ref, b_ref, r_ref, o_ref):
    # x: (1, C, Ts)  w: (O, C)  b: (O, 1)  r: (1, O, Ts)  o: (1, O, Ts)
    # Fused 1x1 conv (per-point linear over channels) + bias + spectral-branch
    # residual.  Channels live on sublanes, points on lanes -> unmasked stores.
    y = jnp.dot(w_ref[...], x_ref[0], preferred_element_type=jnp.float32)
    o_ref[0] = y + b_ref[...] + r_ref[0]


def _spectral_kernel(xr_ref, xi_ref, wr_ref, wi_ref, or_ref, oi_ref):
    # xr/xi: (1, C, Tp)   wr/wi: (C, O, Tp)   or/oi: (1, O, Tp)
    # out[o, p] = sum_c x[c, p] * w[c, o, p]   (complex product, contract C)
    C, O, Tp = wr_ref.shape
    acc_r = jnp.zeros((O, Tp), jnp.float32)
    acc_i = jnp.zeros((O, Tp), jnp.float32)
    # Chunked accumulation over C (C is static -> fully unrolled): keeps one
    # (O, Tp) accumulator plus one (O, Tp) weight slab live; never materializes
    # a (C, O, Tp) temporary.
    for c in range(C):
        xr_c = xr_ref[0, c:c + 1, :]   # (1, Tp)
        xi_c = xi_ref[0, c:c + 1, :]   # (1, Tp)
        wr_c = wr_ref[c]               # (O, Tp)
        wi_c = wi_ref[c]               # (O, Tp)
        acc_r = acc_r + xr_c * wr_c - xi_c * wi_c
        acc_i = acc_i + xr_c * wi_c + xi_c * wr_c
    or_ref[0] = acc_r
    oi_ref[0] = acc_i


# ----------------------------- Pallas wrappers ----------------------------- #

def pallas_conv1x1_add(x_flat, w, b, r_flat):
    """y[n, o, s] = sum_c w[o, c] * x[n, c, s] + b[o] + r[n, o, s]."""
    B, C, S = x_flat.shape
    O = w.shape[0]
    ts = _pick_lane_tile(S, max_tile=2048)
    return pl.pallas_call(
        _conv1x1_add_kernel,
        out_shape=jax.ShapeDtypeStruct((B, O, S), jnp.float32),
        grid=(B, S // ts),
        in_specs=[
            pl.BlockSpec((1, C, ts), lambda bi, si: (bi, 0, si)),
            pl.BlockSpec((O, C), lambda bi, si: (0, 0)),
            pl.BlockSpec((O, 1), lambda bi, si: (0, 0)),
            pl.BlockSpec((1, O, ts), lambda bi, si: (bi, 0, si)),
        ],
        out_specs=pl.BlockSpec((1, O, ts), lambda bi, si: (bi, 0, si)),
        compiler_params=_compiler_params(2),
    )(x_flat, w, b.reshape(O, 1), r_flat)


def pallas_spectral_mul(xr, xi, wr, wi):
    """Complex spectral mixing: out[b, o, p] = sum_c x[b, c, p] * w[c, o, p]."""
    B, C, P = xr.shape
    O = wr.shape[1]
    tp = _pick_lane_tile(P, max_tile=512)
    out_sds = jax.ShapeDtypeStruct((B, O, P), jnp.float32)
    return pl.pallas_call(
        _spectral_kernel,
        out_shape=(out_sds, out_sds),
        grid=(B, P // tp),
        in_specs=[
            pl.BlockSpec((1, C, tp), lambda bi, pi: (bi, 0, pi)),
            pl.BlockSpec((1, C, tp), lambda bi, pi: (bi, 0, pi)),
            pl.BlockSpec((C, O, tp), lambda bi, pi: (0, 0, pi)),
            pl.BlockSpec((C, O, tp), lambda bi, pi: (0, 0, pi)),
        ],
        out_specs=(
            pl.BlockSpec((1, O, tp), lambda bi, pi: (bi, 0, pi)),
            pl.BlockSpec((1, O, tp), lambda bi, pi: (bi, 0, pi)),
        ),
        compiler_params=_compiler_params(2),
    )(xr, xi, wr, wi)


# ------------------------------ FNO3D forward ------------------------------ #

def fno3d_layer_forward(x, params, *, modes):
    """FNO3DLayer.forward: x (B, C, nx, ny, nz) f32 -> (B, O, nx, ny, nz) f32."""
    B, C, nx, ny, nz = x.shape
    O = params["conv_w"].shape[0]
    mx = min(modes, nx)
    my = min(modes, ny)
    mz_full = nz // 2 + 1
    mz = min(modes, mz_full)
    P = mx * my * mz

    # ---- spectral branch ----
    # TODO(synk): rfftn/irfftn have no clean Pallas equivalent; done in jnp.fft.
    x_ft = jnp.fft.rfftn(x, s=(nx, ny, nz), axes=(2, 3, 4))     # (B, C, nx, ny, mz_full) c64
    x_cut = x_ft[:, :, :mx, :my, :mz].reshape(B, C, P)
    xr = jnp.real(x_cut).astype(jnp.float32)
    xi = jnp.imag(x_cut).astype(jnp.float32)

    # Spectral weights are already truncated/reshaped to (C, O, P) at init.
    o_re, o_im = pallas_spectral_mul(xr, xi, params["spec_re"], params["spec_im"])
    out_cut = (o_re + 1j * o_im).astype(jnp.complex64).reshape(B, O, mx, my, mz)

    out_ft = jnp.zeros((B, O, nx, ny, mz_full), dtype=jnp.complex64)
    out_ft = out_ft.at[:, :, :mx, :my, :mz].set(out_cut)
    x_ifft = jnp.fft.irfftn(out_ft, s=(nx, ny, nz), axes=(2, 3, 4))  # (B, O, nx, ny, nz)

    # ---- local branch + sum (fused Pallas kernel, channels-last-on-sublane) ----
    S = nx * ny * nz
    y = pallas_conv1x1_add(
        x.reshape(B, C, S),
        params["conv_w"],
        params["conv_b"],
        x_ifft.reshape(B, O, S).astype(jnp.float32),
    )
    return y.reshape(B, O, nx, ny, nz)


# ------------------------------ parameter init ----------------------------- #

def init_params(key, in_channels, out_channels, modes, *, grid_shape):
    nx, ny, nz = grid_shape
    mx = min(modes, nx)
    my = min(modes, ny)
    mz = min(modes, nz // 2 + 1)
    k1, k2, k3, k4 = jax.random.split(key, 4)
    nrm = lambda k, shape, s: s * jax.random.normal(k, shape, dtype=jnp.float32)

    # Conv3d(C, O, kernel_size=1): weight stored kernel-ready as (O, C), bias (O,)
    conv_w = nrm(k1, (out_channels, in_channels), 0.1)
    conv_b = nrm(k2, (out_channels,), 0.1)

    # Complex spectral weight ~ randn * 0.01 (real/imag stored separately),
    # pre-truncated to kept modes and pre-reshaped to the (C, O, P) layout
    # the spectral kernel consumes (no per-call strided slice/reshape).
    spec_re = nrm(k3, (in_channels, out_channels, modes, modes, modes), 0.01)
    spec_im = nrm(k4, (in_channels, out_channels, modes, modes, modes), 0.01)
    spec_re = spec_re[:, :, :mx, :my, :mz].reshape(in_channels, out_channels, mx * my * mz)
    spec_im = spec_im[:, :, :mx, :my, :mz].reshape(in_channels, out_channels, mx * my * mz)

    return {"conv_w": conv_w, "conv_b": conv_b, "spec_re": spec_re, "spec_im": spec_im}


# ------------------------------ pure-JAX reference -------------------------- #

def reference_forward(x, params, *, modes):
    B, C, nx, ny, nz = x.shape
    O = params["conv_w"].shape[0]
    mx = min(modes, nx)
    my = min(modes, ny)
    mz_full = nz // 2 + 1
    mz = min(modes, mz_full)
    P = mx * my * mz

    x_ft = jnp.fft.rfftn(x, s=(nx, ny, nz), axes=(2, 3, 4))
    x_cut = x_ft[:, :, :mx, :my, :mz].reshape(B, C, P)
    w = (params["spec_re"] + 1j * params["spec_im"]).astype(jnp.complex64)
    out_cut = jnp.einsum("bcp,cop->bop", x_cut, w,
                         precision=jax.lax.Precision.HIGHEST).reshape(B, O, mx, my, mz)
    out_ft = jnp.zeros((B, O, nx, ny, mz_full), dtype=jnp.complex64)
    out_ft = out_ft.at[:, :, :mx, :my, :mz].set(out_cut)
    x_ifft = jnp.fft.irfftn(out_ft, s=(nx, ny, nz), axes=(2, 3, 4))

    x_local = jnp.einsum("oc,bcxyz->boxyz", params["conv_w"], x,
                         precision=jax.lax.Precision.HIGHEST)
    x_local = x_local + params["conv_b"].reshape(1, O, 1, 1, 1)
    return x_ifft + x_local


# ----------------------------------- main ----------------------------------- #

if __name__ == "__main__":
    B = 2
    in_channels = 4
    out_channels = 4
    modes = 4
    grid_shape = (16, 16, 16)

    key = jax.random.PRNGKey(0)
    kx, kp = jax.random.split(key)
    x = jax.random.normal(kx, (B, in_channels) + grid_shape, dtype=jnp.float32)
    params = init_params(kp, in_channels, out_channels, modes, grid_shape=grid_shape)

    fwd = jax.jit(functools.partial(fno3d_layer_forward, modes=modes))
    out = fwd(x, params)
    jax.block_until_ready(out)

    assert out.shape == (B, out_channels) + grid_shape, out.shape
    assert out.dtype == jnp.float32

    ref = reference_forward(x, params, modes=modes)
    max_err = float(jnp.max(jnp.abs(out - ref)))
    assert max_err < 2e-3, f"max abs error vs reference: {max_err}"

    print("KERNEL_OK")
</pallas_src>

<mosaic_0001>
module attributes {stable_mosaic.version = 11 : i64} {
  func.func @_spectral_kernel(%arg0: i32, %arg1: i32, %arg2: memref<1x4x64xf32, #tpu.memory_space<vmem>>, %arg3: memref<1x4x64xf32, #tpu.memory_space<vmem>>, %arg4: memref<4x4x64xf32, #tpu.memory_space<vmem>>, %arg5: memref<4x4x64xf32, #tpu.memory_space<vmem>>, %arg6: memref<1x4x64xf32, #tpu.memory_space<vmem>>, %arg7: memref<1x4x64xf32, #tpu.memory_space<vmem>>) attributes {dimension_semantics = [#tpu.dimension_semantics<parallel>, #tpu.dimension_semantics<parallel>], iteration_bounds = array<i64: 2, 1>, scalar_prefetch = 0 : i64, scratch_operands = 0 : i64, tpu.core_type = #tpu.core_type<tc>, window_params = [{transform_indices = @transform_0, window_bounds = array<i64: 1, 4, 64>}, {transform_indices = @transform_1, window_bounds = array<i64: 1, 4, 64>}, {transform_indices = @transform_2, window_bounds = array<i64: 4, 4, 64>}, {transform_indices = @transform_3, window_bounds = array<i64: 4, 4, 64>}, {transform_indices = @transform_4, window_bounds = array<i64: 1, 4, 64>}, {transform_indices = @transform_5, window_bounds = array<i64: 1, 4, 64>}]} {
    %cst = arith.constant 0.000000e+00 : f32
    %0 = vector.broadcast %cst : f32 to vector<4x64xf32>
    %cst_0 = arith.constant 0.000000e+00 : f32
    %1 = vector.broadcast %cst_0 : f32 to vector<4x64xf32>
    %c0 = arith.constant 0 : index
    %c0_1 = arith.constant 0 : index
    %c0_2 = arith.constant 0 : index
    %2 = vector.load %arg2[%c0, %c0_1, %c0_2] : memref<1x4x64xf32, #tpu.memory_space<vmem>>, vector<1x1x64xf32>
    %3 = vector.shape_cast %2 : vector<1x1x64xf32> to vector<1x64xf32>
    %c0_3 = arith.constant 0 : index
    %c0_4 = arith.constant 0 : index
    %c0_5 = arith.constant 0 : index
    %4 = vector.load %arg3[%c0_3, %c0_4, %c0_5] : memref<1x4x64xf32, #tpu.memory_space<vmem>>, vector<1x1x64xf32>
    %5 = vector.shape_cast %4 : vector<1x1x64xf32> to vector<1x64xf32>
    %c0_6 = arith.constant 0 : index
    %c0_7 = arith.constant 0 : index
    %c0_8 = arith.constant 0 : index
    %6 = vector.load %arg4[%c0_6, %c0_7, %c0_8] : memref<4x4x64xf32, #tpu.memory_space<vmem>>, vector<1x4x64xf32>
    %7 = vector.shape_cast %6 : vector<1x4x64xf32> to vector<4x64xf32>
    %c0_9 = arith.constant 0 : index
    %c0_10 = arith.constant 0 : index
    %c0_11 = arith.constant 0 : index
    %8 = vector.load %arg5[%c0_9, %c0_10, %c0_11] : memref<4x4x64xf32, #tpu.memory_space<vmem>>, vector<1x4x64xf32>
    %9 = vector.shape_cast %8 : vector<1x4x64xf32> to vector<4x64xf32>
    %10 = vector.broadcast %3 : vector<1x64xf32> to vector<4x64xf32>
    %11 = arith.mulf %10, %7 : vector<4x64xf32>
    %12 = arith.addf %0, %11 : vector<4x64xf32>
    %13 = vector.broadcast %5 : vector<1x64xf32> to vector<4x64xf32>
    %14 = arith.mulf %13, %9 : vector<4x64xf32>
    %15 = arith.subf %12, %14 : vector<4x64xf32>
    %16 = vector.broadcast %3 : vector<1x64xf32> to vector<4x64xf32>
    %17 = arith.mulf %16, %9 : vector<4x64xf32>
    %18 = arith.addf %1, %17 : vector<4x64xf32>
    %19 = vector.broadcast %5 : vector<1x64xf32> to vector<4x64xf32>
    %20 = arith.mulf %19, %7 : vector<4x64xf32>
    %21 = arith.addf %18, %20 : vector<4x64xf32>
    %c0_12 = arith.constant 0 : index
    %c1 = arith.constant 1 : index
    %c0_13 = arith.constant 0 : index
    %22 = vector.load %arg2[%c0_12, %c1, %c0_13] : memref<1x4x64xf32, #tpu.memory_space<vmem>>, vector<1x1x64xf32>
    %23 = vector.shape_cast %22 : vector<1x1x64xf32> to vector<1x64xf32>
    %c0_14 = arith.constant 0 : index
    %c1_15 = arith.constant 1 : index
    %c0_16 = arith.constant 0 : index
    %24 = vector.load %arg3[%c0_14, %c1_15, %c0_16] : memref<1x4x64xf32, #tpu.memory_space<vmem>>, vector<1x1x64xf32>
    %25 = vector.shape_cast %24 : vector<1x1x64xf32> to vector<1x64xf32>
    %c1_17 = arith.constant 1 : index
    %c0_18 = arith.constant 0 : index
    %c0_19 = arith.constant 0 : index
    %26 = vector.load %arg4[%c1_17, %c0_18, %c0_19] : memref<4x4x64xf32, #tpu.memory_space<vmem>>, vector<1x4x64xf32>
    %27 = vector.shape_cast %26 : vector<1x4x64xf32> to vector<4x64xf32>
    %c1_20 = arith.constant 1 : index
    %c0_21 = arith.constant 0 : index
    %c0_22 = arith.constant 0 : index
    %28 = vector.load %arg5[%c1_20, %c0_21, %c0_22] : memref<4x4x64xf32, #tpu.memory_space<vmem>>, vector<1x4x64xf32>
    %29 = vector.shape_cast %28 : vector<1x4x64xf32> to vector<4x64xf32>
    %30 = vector.broadcast %23 : vector<1x64xf32> to vector<4x64xf32>
    %31 = arith.mulf %30, %27 : vector<4x64xf32>
    %32 = arith.addf %15, %31 : vector<4x64xf32>
    %33 = vector.broadcast %25 : vector<1x64xf32> to vector<4x64xf32>
    %34 = arith.mulf %33, %29 : vector<4x64xf32>
    %35 = arith.subf %32, %34 : vector<4x64xf32>
    %36 = vector.broadcast %23 : vector<1x64xf32> to vector<4x64xf32>
    %37 = arith.mulf %36, %29 : vector<4x64xf32>
    %38 = arith.addf %21, %37 : vector<4x64xf32>
    %39 = vector.broadcast %25 : vector<1x64xf32> to vector<4x64xf32>
    %40 = arith.mulf %39, %27 : vector<4x64xf32>
    %41 = arith.addf %38, %40 : vector<4x64xf32>
    %c0_23 = arith.constant 0 : index
    %c2 = arith.constant 2 : index
    %c0_24 = arith.constant 0 : index
    %42 = vector.load %arg2[%c0_23, %c2, %c0_24] : memref<1x4x64xf32, #tpu.memory_space<vmem>>, vector<1x1x64xf32>
    %43 = vector.shape_cast %42 : vector<1x1x64xf32> to vector<1x64xf32>
    %c0_25 = arith.constant 0 : index
    %c2_26 = arith.constant 2 : index
    %c0_27 = arith.constant 0 : index
    %44 = vector.load %arg3[%c0_25, %c2_26, %c0_27] : memref<1x4x64xf32, #tpu.memory_space<vmem>>, vector<1x1x64xf32>
    %45 = vector.shape_cast %44 : vector<1x1x64xf32> to vector<1x64xf32>
    %c2_28 = arith.constant 2 : index
    %c0_29 = arith.constant 0 : index
    %c0_30 = arith.constant 0 : index
    %46 = vector.load %arg4[%c2_28, %c0_29, %c0_30] : memref<4x4x64xf32, #tpu.memory_space<vmem>>, vector<1x4x64xf32>
    %47 = vector.shape_cast %46 : vector<1x4x64xf32> to vector<4x64xf32>
    %c2_31 = arith.constant 2 : index
    %c0_32 = arith.constant 0 : index
    %c0_33 = arith.constant 0 : index
    %48 = vector.load %arg5[%c2_31, %c0_32, %c0_33] : memref<4x4x64xf32, #tpu.memory_space<vmem>>, vector<1x4x64xf32>
    %49 = vector.shape_cast %48 : vector<1x4x64xf32> to vector<4x64xf32>
    %50 = vector.broadcast %43 : vector<1x64xf32> to vector<4x64xf32>
    %51 = arith.mulf %50, %47 : vector<4x64xf32>
    %52 = arith.addf %35, %51 : vector<4x64xf32>
    %53 = vector.broadcast %45 : vector<1x64xf32> to vector<4x64xf32>
    %54 = arith.mulf %53, %49 : vector<4x64xf32>
    %55 = arith.subf %52, %54 : vector<4x64xf32>
    %56 = vector.broadcast %43 : vector<1x64xf32> to vector<4x64xf32>
    %57 = arith.mulf %56, %49 : vector<4x64xf32>
    %58 = arith.addf %41, %57 : vector<4x64xf32>
    %59 = vector.broadcast %45 : vector<1x64xf32> to vector<4x64xf32>
    %60 = arith.mulf %59, %47 : vector<4x64xf32>
    %61 = arith.addf %58, %60 : vector<4x64xf32>
    %c0_34 = arith.constant 0 : index
    %c3 = arith.constant 3 : index
    %c0_35 = arith.constant 0 : index
    %62 = vector.load %arg2[%c0_34, %c3, %c0_35] : memref<1x4x64xf32, #tpu.memory_space<vmem>>, vector<1x1x64xf32>
    %63 = vector.shape_cast %62 : vector<1x1x64xf32> to vector<1x64xf32>
    %c0_36 = arith.constant 0 : index
    %c3_37 = arith.constant 3 : index
    %c0_38 = arith.constant 0 : index
    %64 = vector.load %arg3[%c0_36, %c3_37, %c0_38] : memref<1x4x64xf32, #tpu.memory_space<vmem>>, vector<1x1x64xf32>
    %65 = vector.shape_cast %64 : vector<1x1x64xf32> to vector<1x64xf32>
    %c3_39 = arith.constant 3 : index
    %c0_40 = arith.constant 0 : index
    %c0_41 = arith.constant 0 : index
    %66 = vector.load %arg4[%c3_39, %c0_40, %c0_41] : memref<4x4x64xf32, #tpu.memory_space<vmem>>, vector<1x4x64xf32>
    %67 = vector.shape_cast %66 : vector<1x4x64xf32> to vector<4x64xf32>
    %c3_42 = arith.constant 3 : index
    %c0_43 = arith.constant 0 : index
    %c0_44 = arith.constant 0 : index
    %68 = vector.load %arg5[%c3_42, %c0_43, %c0_44] : memref<4x4x64xf32, #tpu.memory_space<vmem>>, vector<1x4x64xf32>
    %69 = vector.shape_cast %68 : vector<1x4x64xf32> to vector<4x64xf32>
    %70 = vector.broadcast %63 : vector<1x64xf32> to vector<4x64xf32>
    %71 = arith.mulf %70, %67 : vector<4x64xf32>
    %72 = arith.addf %55, %71 : vector<4x64xf32>
    %73 = vector.broadcast %65 : vector<1x64xf32> to vector<4x64xf32>
    %74 = arith.mulf %73, %69 : vector<4x64xf32>
    %75 = arith.subf %72, %74 : vector<4x64xf32>
    %76 = vector.broadcast %63 : vector<1x64xf32> to vector<4x64xf32>
    %77 = arith.mulf %76, %69 : vector<4x64xf32>
    %78 = arith.addf %61, %77 : vector<4x64xf32>
    %79 = vector.broadcast %65 : vector<1x64xf32> to vector<4x64xf32>
    %80 = arith.mulf %79, %67 : vector<4x64xf32>
    %81 = arith.addf %78, %80 : vector<4x64xf32>
    %c0_45 = arith.constant 0 : index
    %c0_46 = arith.constant 0 : index
    %c0_47 = arith.constant 0 : index
    %82 = vector.load %arg6[%c0_45, %c0_46, %c0_47] : memref<1x4x64xf32, #tpu.memory_space<vmem>>, vector<1x4x64xf32>
    %83 = vector.shape_cast %82 : vector<1x4x64xf32> to vector<4x64xf32>
    %84 = vector.shape_cast %75 : vector<4x64xf32> to vector<1x4x64xf32>
    tpu.vector_store %arg6[%c0_45, %c0_46, %c0_47], %84 {strides = array<i32>} : memref<1x4x64xf32, #tpu.memory_space<vmem>>, vector<1x4x64xf32>,
    %c0_48 = arith.constant 0 : index
    %c0_49 = arith.constant 0 : index
    %c0_50 = arith.constant 0 : index
    %85 = vector.load %arg7[%c0_48, %c0_49, %c0_50] : memref<1x4x64xf32, #tpu.memory_space<vmem>>, vector<1x4x64xf32>
    %86 = vector.shape_cast %85 : vector<1x4x64xf32> to vector<4x64xf32>
    %87 = vector.shape_cast %81 : vector<4x64xf32> to vector<1x4x64xf32>
    tpu.vector_store %arg7[%c0_48, %c0_49, %c0_50], %87 {strides = array<i32>} : memref<1x4x64xf32, #tpu.memory_space<vmem>>, vector<1x4x64xf32>,
    return
  }
  func.func @transform_0(%arg0: i32, %arg1: i32) -> (i32, i32, i32) {
    %c0_i32 = arith.constant 0 : i32
    %c0_i32_0 = arith.constant 0 : i32
    return %arg0, %c0_i32, %arg1 : i32, i32, i32
  }
  func.func @transform_1(%arg0: i32, %arg1: i32) -> (i32, i32, i32) {
    %c0_i32 = arith.constant 0 : i32
    %c0_i32_0 = arith.constant 0 : i32
    return %arg0, %c0_i32, %arg1 : i32, i32, i32
  }
  func.func @transform_2(%arg0: i32, %arg1: i32) -> (i32, i32, i32) {
    %c0_i32 = arith.constant 0 : i32
    %c0_i32_0 = arith.constant 0 : i32
    %c0_i32_1 = arith.constant 0 : i32
    return %c0_i32, %c0_i32_0, %arg1 : i32, i32, i32
  }
  func.func @transform_3(%arg0: i32, %arg1: i32) -> (i32, i32, i32) {
    %c0_i32 = arith.constant 0 : i32
    %c0_i32_0 = arith.constant 0 : i32
    %c0_i32_1 = arith.constant 0 : i32
    return %c0_i32, %c0_i32_0, %arg1 : i32, i32, i32
  }
  func.func @transform_4(%arg0: i32, %arg1: i32) -> (i32, i32, i32) {
    %c0_i32 = arith.constant 0 : i32
    %c0_i32_0 = arith.constant 0 : i32
    return %arg0, %c0_i32, %arg1 : i32, i32, i32
  }
  func.func @transform_5(%arg0: i32, %arg1: i32) -> (i32, i32, i32) {
    %c0_i32 = arith.constant 0 : i32
    %c0_i32_0 = arith.constant 0 : i32
    return %arg0, %c0_i32, %arg1 : i32, i32, i32
  }
}

module attributes {stable_mosaic.version = 11 : i64} {
  func.func @_conv1x1_add_kernel(%arg0: i32, %arg1: i32, %arg2: memref<1x4x2048xf32, #tpu.memory_space<vmem>>, %arg3: memref<4x4xf32, #tpu.memory_space<vmem>>, %arg4: memref<4x1xf32, #tpu.memory_space<vmem>>, %arg5: memref<1x4x2048xf32, #tpu.memory_space<vmem>>, %arg6: memref<1x4x2048xf32, #tpu.memory_space<vmem>>) attributes {dimension_semantics = [#tpu.dimension_semantics<parallel>, #tpu.dimension_semantics<parallel>], iteration_bounds = array<i64: 2, 2>, scalar_prefetch = 0 : i64, scratch_operands = 0 : i64, tpu.core_type = #tpu.core_type<tc>, window_params = [{transform_indices = @transform_0, window_bounds = array<i64: 1, 4, 2048>}, {pipeline_mode = #tpu.pipeline_mode<synchronous>, transform_indices = @transform_1, window_bounds = array<i64: 4, 4>}, {pipeline_mode = #tpu.pipeline_mode<synchronous>, transform_indices = @transform_2, window_bounds = array<i64: 4, 1>}, {transform_indices = @transform_3, window_bounds = array<i64: 1, 4, 2048>}, {transform_indices = @transform_4, window_bounds = array<i64: 1, 4, 2048>}]} {
    %c0 = arith.constant 0 : index
    %c0_0 = arith.constant 0 : index
    %0 = vector.load %arg3[%c0, %c0_0] : memref<4x4xf32, #tpu.memory_space<vmem>>, vector<4x4xf32>
    %c0_1 = arith.constant 0 : index
    %c0_2 = arith.constant 0 : index
    %c0_3 = arith.constant 0 : index
    %1 = vector.load %arg2[%c0_1, %c0_2, %c0_3] : memref<1x4x2048xf32, #tpu.memory_space<vmem>>, vector<1x4x2048xf32>
    %2 = vector.shape_cast %1 : vector<1x4x2048xf32> to vector<4x2048xf32>
    %cst = arith.constant dense<0.000000e+00> : vector<4x2048xf32>
    %3 = tpu.matmul %0, %2, %cst {dimension_numbers = #tpu.dot_dimension_numbers<[1], [0], [0], [1], [0, 0, 1, 1], [], []>} : vector<4x4xf32>, vector<4x2048xf32>, vector<4x2048xf32> -> vector<4x2048xf32>
    %c0_4 = arith.constant 0 : index
    %c0_5 = arith.constant 0 : index
    %4 = vector.load %arg4[%c0_4, %c0_5] : memref<4x1xf32, #tpu.memory_space<vmem>>, vector<4x1xf32>
    %5 = vector.broadcast %4 : vector<4x1xf32> to vector<4x2048xf32>
    %6 = arith.addf %3, %5 : vector<4x2048xf32>
    %c0_6 = arith.constant 0 : index
    %c0_7 = arith.constant 0 : index
    %c0_8 = arith.constant 0 : index
    %7 = vector.load %arg5[%c0_6, %c0_7, %c0_8] : memref<1x4x2048xf32, #tpu.memory_space<vmem>>, vector<1x4x2048xf32>
    %8 = vector.shape_cast %7 : vector<1x4x2048xf32> to vector<4x2048xf32>
    %9 = arith.addf %6, %8 : vector<4x2048xf32>
    %c0_9 = arith.constant 0 : index
    %c0_10 = arith.constant 0 : index
    %c0_11 = arith.constant 0 : index
    %10 = vector.load %arg6[%c0_9, %c0_10, %c0_11] : memref<1x4x2048xf32, #tpu.memory_space<vmem>>, vector<1x4x2048xf32>
    %11 = vector.shape_cast %10 : vector<1x4x2048xf32> to vector<4x2048xf32>
    %12 = vector.shape_cast %9 : vector<4x2048xf32> to vector<1x4x2048xf32>
    tpu.vector_store %arg6[%c0_9, %c0_10, %c0_11], %12 {strides = array<i32>} : memref<1x4x2048xf32, #tpu.memory_space<vmem>>, vector<1x4x2048xf32>,
    return
  }
  func.func @transform_0(%arg0: i32, %arg1: i32) -> (i32, i32, i32) {
    %c0_i32 = arith.constant 0 : i32
    %c0_i32_0 = arith.constant 0 : i32
    return %arg0, %c0_i32, %arg1 : i32, i32, i32
  }
  func.func @transform_1(%arg0: i32, %arg1: i32) -> (i32, i32) {
    %c0_i32 = arith.constant 0 : i32
    %c0_i32_0 = arith.constant 0 : i32
    %c0_i32_1 = arith.constant 0 : i32
    return %c0_i32, %c0_i32_0 : i32, i32
  }
  func.func @transform_2(%arg0: i32, %arg1: i32) -> (i32, i32) {
    %c0_i32 = arith.constant 0 : i32
    %c0_i32_0 = arith.constant 0 : i32
    %c0_i32_1 = arith.constant 0 : i32
    return %c0_i32, %c0_i32_0 : i32, i32
  }
  func.func @transform_3(%arg0: i32, %arg1: i32) -> (i32, i32, i32) {
    %c0_i32 = arith.constant 0 : i32
    %c0_i32_0 = arith.constant 0 : i32
    return %arg0, %c0_i32, %arg1 : i32, i32, i32
  }
  func.func @transform_4(%arg0: i32, %arg1: i32) -> (i32, i32, i32) {
    %c0_i32 = arith.constant 0 : i32
    %c0_i32_0 = arith.constant 0 : i32
    return %arg0, %c0_i32, %arg1 : i32, i32, i32
  }
}

</mosaic_0001>

<bundles_post_ra>
// kernel: fno3d_layer_forward.2
= control target key start
LH: loop header
LB: loop body
LE: loop exit
PB: predicated region body
PF: predicated region fallthrough
CT: control target
= control target key end

     0   :  { %s687_s18 = smov 0   ;;  %s689_s19 = smov 0   ;;  %s762_s0 = inlined_call_operand.vmem [shape: f32[2,4,64], index: 0, kind: input, shape index: {}]   ;;  %s763_s1 = inlined_call_operand.vmem [shape: f32[2,4,64], index: 1, kind: input, shape index: {}]   ;;  %s764_s2 = inlined_call_operand.vmem [shape: f32[4,4,64], index: 2, kind: input, shape index: {}]   ;;  %s765_s3 = inlined_call_operand.vmem [shape: f32[4,4,64], index: 3, kind: input, shape index: {}]   ;;  %s766_s4 = inlined_call_operand.vmem [shape: f32[2,4,64], index: 4, kind: output, shape index: {0}]   ;;  %s767_s5 = inlined_call_operand.vmem [shape: f32[2,4,64], index: 5, kind: output, shape index: {1}]  }
   0x1   :  { %s691_s20 = smov 0  }
   0x2 LB: > { %s28_s21 = sadd.s32 1, %s651_s19  ;;  %p588_p0 = scmp.ge.s32.totalorder %s655_s20, 1  ;;  %s655_s20 = sphi %s691_s20, %s16_s20   ;;  %s651_s19 = sphi %s689_s19, %s769_s19   ;;  %s647_s18 = sphi %s687_s18, %s768_s18  }
   0x3   : > { %p30_p1 = scmp.ge.s32.totalorder %s28_s21, 2  ;;  %p242_p2 = scmp.lt.s32.totalorder %s655_s20, 3 }
   0x5   : > { %s771_s21 = smov (%p30_p1, %s28_s21), 0  ;;  %p243_p3 = pnand %p588_p0, %p242_p2 }
   0x6   : > { %p296_p4 = scmp.lt.s32.totalorder (!%p243_p3), %s647_s18, 1  ;;  %v334_v0 = vld [vmem:[%s764_s2] sm:$0xf] (!%p243_p3)  ;;  %v595_v2 = vld [vmem:[%s764_s2 + $0x4] sm:$0xf] (!%p243_p3)  ;;  %vm418_vm0 = vcmask (!%p243_p3), 519168  }
   0x7   : > { %246 = sbr.rel (%p243_p3) target bundleno = 36 (0x24), region = 36  ;;  %v335_v1 = vld [vmem:[%s765_s3] sm:$0xf] (!%p243_p3)  ;;  %v596_v3 = vld [vmem:[%s765_s3 + $0x4] sm:$0xf] (!%p243_p3) }
   0x8   : > { %v599_v15 = vld [vmem:[%s764_s2 + $0x8] sm:$0xf] (!%p243_p3)  ;;  %v603_v25 = vld [vmem:[%s764_s2 + $0xc] sm:$0xf] (!%p243_p3) }
   0x9   : > { %v600_v18 = vld [vmem:[%s765_s3 + $0x8] sm:$0xf] (!%p243_p3)  ;;  %v604_v30 = vld [vmem:[%s765_s3 + $0xc] sm:$0xf] (!%p243_p3) }
   0xe   : > { %s773_s18 = smov (!%p296_p4, %s647_s18), 1 }
   0xf   : > { %s705_s22 = sshll.u32 %s773_s18, 2 }
  0x10   : > { %s302_s29 = scalar_lea.vmem %s762_s0, %s705_s22  ;;  %s721_s7 = scalar_lea.vmem %s763_s1, %s705_s22 }
  0x11   : > { %v593_v4 = vld [vmem:[%s302_s29] ss:$0 sm:$0xff]  ;;  %v597_v6 = vld [vmem:[%s302_s29 + $0x1] ss:$0 sm:$0xff]  ;;  %v601_v14 = vld [vmem:[%s302_s29 + $0x2] ss:$0 sm:$0xff]  ;;  %s324_s26 = scalar_lea.vmem %s766_s4, %s705_s22 }
  0x12   : > { %v594_v5 = vld [vmem:[%s721_s7] ss:$0 sm:$0xff]  ;;  %v340_v7 = vmul.f32 %v593_v4, %v334_v0  ;;  %v348_v9 = vmul.f32 %v593_v4, %v335_v1  ;;  %v598_v11 = vld [vmem:[%s721_s7 + $0x1] ss:$0 sm:$0xff]  ;;  %v362_v12 = vmul.f32 %v597_v6, %v595_v2  ;;  %v370_v13 = vmul.f32 %v597_v6, %v596_v3  ;;  %v602_v19 = vld [vmem:[%s721_s7 + $0x2] ss:$0 sm:$0xff] }
  0x13   : > { %v346_v8 = vmul.f32 %v594_v5, %v335_v1  ;;  %v350_v10 = vmul.f32 %v594_v5, %v334_v0  ;;  %v368_v17 = vmul.f32 %v598_v11, %v596_v3  ;;  %v372_v21 = vmul.f32 %v598_v11, %v595_v2  ;;  %v605_v24 = vld [vmem:[%s302_s29 + $0x3] ss:$0 sm:$0xff]  ;;  %s331_s29 = scalar_lea.vmem %s767_s5, %s705_s22 }
  0x14   : > { %v384_v23 = vmul.f32 %v601_v14, %v599_v15  ;;  %v392_v27 = vmul.f32 %v601_v14, %v600_v18  ;;  %v390_v29 = vmul.f32 %v602_v19, %v600_v18  ;;  %v606_v31 = vld [vmem:[%s721_s7 + $0x3] ss:$0 sm:$0xff]  ;;  %v394_v33 = vmul.f32 %v602_v19, %v599_v15 }
  0x15   : > { %v347_v16 = vsub.f32 %v340_v7, %v346_v8  ;;  %v351_v20 = vadd.f32 %v350_v10, %v348_v9  ;;  %v406_v35 = vmul.f32 %v605_v24, %v603_v25  ;;  %v414_v37 = vmul.f32 %v605_v24, %v604_v30 }
  0x16   : > { %v412_v39 = vmul.f32 %v606_v31, %v604_v30  ;;  %v416_v41 = vmul.f32 %v606_v31, %v603_v25 }
  0x17   : > { %v363_v22 = vadd.f32 %v362_v12, %v347_v16  ;;  %v371_v26 = vadd.f32 %v370_v13, %v351_v20 }
  0x19   : > { %v369_v28 = vsub.f32 %v363_v22, %v368_v17  ;;  %v373_v32 = vadd.f32 %v372_v21, %v371_v26 }
  0x1b   : > { %v385_v34 = vadd.f32 %v384_v23, %v369_v28  ;;  %v393_v36 = vadd.f32 %v392_v27, %v373_v32 }
  0x1d   : > { %v391_v38 = vsub.f32 %v385_v34, %v390_v29  ;;  %v395_v40 = vadd.f32 %v394_v33, %v393_v36 }
  0x1f   : > { %v407_v42 = vadd.f32 %v406_v35, %v391_v38  ;;  %v415_v43 = vadd.f32 %v414_v37, %v395_v40 }
  0x21   : > { %v413_v44 = vsub.f32 %v407_v42, %v412_v39  ;;  %v417_v45 = vadd.f32 %v416_v41, %v415_v43 }
  0x23   : > { %419 = vst.msk [vmem:[%s324_s26] sm:$0xf] %vm418_vm0, %v413_v44  ;;  %420 = vst.msk [vmem:[%s331_s29] sm:$0xf] %vm418_vm0, %v417_v45 }
  0x24 PF: > { %s16_s20 = sadd.s32 1, %s655_s20   ;;  %s768_s18 = smov %s651_s19 }
  0x25   : > { %p13_p5 = scmp.ge.s32.totalorder %s16_s20, 4   ;;  %s769_s19 = smov %s771_s21 }
  0x27   :  { %15 = sbr.rel (!%p13_p5) target bundleno = 2 (0x2), region = 93 }

// kernel: reverse.1
= control target key start
LH: loop header
LB: loop body
LE: loop exit
PB: predicated region body
PF: predicated region fallthrough
CT: control target
= control target key end

     0   :  { %s1352_s0 = inlined_call_operand.vmem [shape: f32[2,4,16,16,7], index: 0, kind: input, shape index: {}]   ;;  %s1353_s1 = inlined_call_operand.vmem [shape: f32[2,4,16,16,7], index: 1, kind: output, shape index: {}]  }
   0x1   :  { %v448_v0 = vld [vmem:[%s1352_s0 + $0x60] sm:$0xff]  ;;  %v451_v2 = vld [vmem:[%s1352_s0 + $0xd0] sm:$0xff]  ;;  %v558_v56 = vld [vmem:[%s1352_s0 + $0x68] sm:$0xff] }
   0x2   :  { %v449_v1 = vld [vmem:[%s1352_s0 + $0x220] sm:$0xff]  ;;  %4 = vst [vmem:[%s1353_s1] sm:$0xff] %v448_v0  ;;  %452 = vst [vmem:[%s1353_s1 + $0x70] sm:$0xff] %v451_v2  ;;  %v453_v3 = vld [vmem:[%s1352_s0 + $0x290] sm:$0xff] }
   0x3   :  { %450 = vst [vmem:[%s1353_s1 + $0x1c0] sm:$0xff] %v449_v1  ;;  %v455_v4 = vld [vmem:[%s1352_s0 + $0x140] sm:$0xff]  ;;  %454 = vst [vmem:[%s1353_s1 + $0x230] sm:$0xff] %v453_v3  ;;  %v459_v6 = vld [vmem:[%s1352_s0 + $0x1b0] sm:$0xff] }
   0x4   :  { %v457_v5 = vld [vmem:[%s1352_s0 + $0x300] sm:$0xff]  ;;  %456 = vst [vmem:[%s1353_s1 + $0xe0] sm:$0xff] %v455_v4  ;;  %v461_v7 = vld [vmem:[%s1352_s0 + $0x370] sm:$0xff]  ;;  %460 = vst [vmem:[%s1353_s1 + $0x150] sm:$0xff] %v459_v6 }
   0x5   :  { %458 = vst [vmem:[%s1353_s1 + $0x2a0] sm:$0xff] %v457_v5  ;;  %v463_v8 = vld [vmem:[%s1352_s0 + $0x50] sm:$0xff]  ;;  %462 = vst [vmem:[%s1353_s1 + $0x310] sm:$0xff] %v461_v7  ;;  %v467_v10 = vld [vmem:[%s1352_s0 + $0xc0] sm:$0xff] }
   0x6   :  { %464 = vst [vmem:[%s1353_s1 + $0x10] sm:$0xff] %v463_v8  ;;  %v465_v9 = vld [vmem:[%s1352_s0 + $0x210] sm:$0xff]  ;;  %v469_v11 = vld [vmem:[%s1352_s0 + $0x280] sm:$0xff]  ;;  %468 = vst [vmem:[%s1353_s1 + $0x80] sm:$0xff] %v467_v10 }
   0x7   :  { %466 = vst [vmem:[%s1353_s1 + $0x1d0] sm:$0xff] %v465_v9  ;;  %470 = vst [vmem:[%s1353_s1 + $0x240] sm:$0xff] %v469_v11  ;;  %v471_v12 = vld [vmem:[%s1352_s0 + $0x130] sm:$0xff]  ;;  %v475_v14 = vld [vmem:[%s1352_s0 + $0x1a0] sm:$0xff] }
   0x8   :  { %v473_v13 = vld [vmem:[%s1352_s0 + $0x2f0] sm:$0xff]  ;;  %472 = vst [vmem:[%s1353_s1 + $0xf0] sm:$0xff] %v471_v12  ;;  %476 = vst [vmem:[%s1353_s1 + $0x160] sm:$0xff] %v475_v14  ;;  %v477_v15 = vld [vmem:[%s1352_s0 + $0x360] sm:$0xff] }
   0x9   :  { %474 = vst [vmem:[%s1353_s1 + $0x2b0] sm:$0xff] %v473_v13  ;;  %v479_v16 = vld [vmem:[%s1352_s0 + $0x40] sm:$0xff]  ;;  %478 = vst [vmem:[%s1353_s1 + $0x320] sm:$0xff] %v477_v15  ;;  %v483_v18 = vld [vmem:[%s1352_s0 + $0xb0] sm:$0xff] }
   0xa   :  { %v481_v17 = vld [vmem:[%s1352_s0 + $0x200] sm:$0xff]  ;;  %480 = vst [vmem:[%s1353_s1 + $0x20] sm:$0xff] %v479_v16  ;;  %v485_v19 = vld [vmem:[%s1352_s0 + $0x270] sm:$0xff]  ;;  %484 = vst [vmem:[%s1353_s1 + $0x90] sm:$0xff] %v483_v18 }
   0xb   :  { %482 = vst [vmem:[%s1353_s1 + $0x1e0] sm:$0xff] %v481_v17  ;;  %v487_v20 = vld [vmem:[%s1352_s0 + $0x120] sm:$0xff]  ;;  %486 = vst [vmem:[%s1353_s1 + $0x250] sm:$0xff] %v485_v19  ;;  %v491_v22 = vld [vmem:[%s1352_s0 + $0x190] sm:$0xff] }
   0xc   :  { %488 = vst [vmem:[%s1353_s1 + $0x100] sm:$0xff] %v487_v20  ;;  %v489_v21 = vld [vmem:[%s1352_s0 + $0x2e0] sm:$0xff]  ;;  %v493_v23 = vld [vmem:[%s1352_s0 + $0x350] sm:$0xff]  ;;  %492 = vst [vmem:[%s1353_s1 + $0x170] sm:$0xff] %v491_v22 }
   0xd   :  { %490 = vst [vmem:[%s1353_s1 + $0x2c0] sm:$0xff] %v489_v21  ;;  %494 = vst [vmem:[%s1353_s1 + $0x330] sm:$0xff] %v493_v23  ;;  %v495_v24 = vld [vmem:[%s1352_s0 + $0x30] sm:$0xff]  ;;  %v499_v26 = vld [vmem:[%s1352_s0 + $0xa0] sm:$0xff] }
   0xe   :  { %v497_v25 = vld [vmem:[%s1352_s0 + $0x1f0] sm:$0xff]  ;;  %496 = vst [vmem:[%s1353_s1 + $0x30] sm:$0xff] %v495_v24  ;;  %500 = vst [vmem:[%s1353_s1 + $0xa0] sm:$0xff] %v499_v26  ;;  %v501_v27 = vld [vmem:[%s1352_s0 + $0x260] sm:$0xff] }
   0xf   :  { %498 = vst [vmem:[%s1353_s1 + $0x1f0] sm:$0xff] %v497_v25  ;;  %v503_v28 = vld [vmem:[%s1352_s0 + $0x110] sm:$0xff]  ;;  %502 = vst [vmem:[%s1353_s1 + $0x260] sm:$0xff] %v501_v27  ;;  %v507_v30 = vld [vmem:[%s1352_s0 + $0x180] sm:$0xff] }
  0x10   :  { %v505_v29 = vld [vmem:[%s1352_s0 + $0x2d0] sm:$0xff]  ;;  %504 = vst [vmem:[%s1353_s1 + $0x110] sm:$0xff] %v503_v28  ;;  %v509_v31 = vld [vmem:[%s1352_s0 + $0x340] sm:$0xff]  ;;  %508 = vst [vmem:[%s1353_s1 + $0x180] sm:$0xff] %v507_v30 }
  0x11   :  { %506 = vst [vmem:[%s1353_s1 + $0x2d0] sm:$0xff] %v505_v29  ;;  %v511_v32 = vld [vmem:[%s1352_s0 + $0x20] sm:$0xff]  ;;  %510 = vst [vmem:[%s1353_s1 + $0x340] sm:$0xff] %v509_v31  ;;  %v515_v34 = vld [vmem:[%s1352_s0 + $0x90] sm:$0xff] }
  0x12   :  { %512 = vst [vmem:[%s1353_s1 + $0x40] sm:$0xff] %v511_v32  ;;  %v513_v33 = vld [vmem:[%s1352_s0 + $0x1e0] sm:$0xff]  ;;  %v517_v35 = vld [vmem:[%s1352_s0 + $0x250] sm:$0xff]  ;;  %516 = vst [vmem:[%s1353_s1 + $0xb0] sm:$0xff] %v515_v34 }
  0x13   :  { %514 = vst [vmem:[%s1353_s1 + $0x200] sm:$0xff] %v513_v33  ;;  %518 = vst [vmem:[%s1353_s1 + $0x270] sm:$0xff] %v517_v35  ;;  %v519_v36 = vld [vmem:[%s1352_s0 + $0x100] sm:$0xff]  ;;  %v523_v38 = vld [vmem:[%s1352_s0 + $0x170] sm:$0xff] }
  0x14   :  { %v521_v37 = vld [vmem:[%s1352_s0 + $0x2c0] sm:$0xff]  ;;  %520 = vst [vmem:[%s1353_s1 + $0x120] sm:$0xff] %v519_v36  ;;  %524 = vst [vmem:[%s1353_s1 + $0x190] sm:$0xff] %v523_v38  ;;  %v525_v39 = vld [vmem:[%s1352_s0 + $0x330] sm:$0xff] }
  0x15   :  { %522 = vst [vmem:[%s1353_s1 + $0x2e0] sm:$0xff] %v521_v37  ;;  %v527_v40 = vld [vmem:[%s1352_s0 + $0x10] sm:$0xff]  ;;  %526 = vst [vmem:[%s1353_s1 + $0x350] sm:$0xff] %v525_v39  ;;  %v531_v42 = vld [vmem:[%s1352_s0 + $0x80] sm:$0xff] }
  0x16   :  { %v529_v41 = vld [vmem:[%s1352_s0 + $0x1d0] sm:$0xff]  ;;  %528 = vst [vmem:[%s1353_s1 + $0x50] sm:$0xff] %v527_v40  ;;  %v533_v43 = vld [vmem:[%s1352_s0 + $0x240] sm:$0xff]  ;;  %532 = vst [vmem:[%s1353_s1 + $0xc0] sm:$0xff] %v531_v42 }
  0x17   :  { %530 = vst [vmem:[%s1353_s1 + $0x210] sm:$0xff] %v529_v41  ;;  %v535_v44 = vld [vmem:[%s1352_s0 + $0xf0] sm:$0xff]  ;;  %534 = vst [vmem:[%s1353_s1 + $0x280] sm:$0xff] %v533_v43  ;;  %v539_v46 = vld [vmem:[%s1352_s0 + $0x160] sm:$0xff] }
  0x18   :  { %536 = vst [vmem:[%s1353_s1 + $0x130] sm:$0xff] %v535_v44  ;;  %v537_v45 = vld [vmem:[%s1352_s0 + $0x2b0] sm:$0xff]  ;;  %v541_v47 = vld [vmem:[%s1352_s0 + $0x320] sm:$0xff]  ;;  %540 = vst [vmem:[%s1353_s1 + $0x1a0] sm:$0xff] %v539_v46 }
  0x19   :  { %538 = vst [vmem:[%s1353_s1 + $0x2f0] sm:$0xff] %v537_v45  ;;  %542 = vst [vmem:[%s1353_s1 + $0x360] sm:$0xff] %v541_v47  ;;  %v193_v48 = vld [vmem:[%s1352_s0] sm:$0xff]  ;;  %v546_v50 = vld [vmem:[%s1352_s0 + $0x70] sm:$0xff] }
  0x1a   :  { %v544_v49 = vld [vmem:[%s1352_s0 + $0x1c0] sm:$0xff]  ;;  %543 = vst [vmem:[%s1353_s1 + $0x60] sm:$0xff] %v193_v48  ;;  %547 = vst [vmem:[%s1353_s1 + $0xd0] sm:$0xff] %v546_v50  ;;  %v548_v51 = vld [vmem:[%s1352_s0 + $0x230] sm:$0xff] }
  0x1b   :  { %545 = vst [vmem:[%s1353_s1 + $0x220] sm:$0xff] %v544_v49  ;;  %v550_v52 = vld [vmem:[%s1352_s0 + $0xe0] sm:$0xff]  ;;  %549 = vst [vmem:[%s1353_s1 + $0x290] sm:$0xff] %v548_v51  ;;  %v554_v54 = vld [vmem:[%s1352_s0 + $0x150] sm:$0xff] }
  0x1c   :  { %v552_v53 = vld [vmem:[%s1352_s0 + $0x2a0] sm:$0xff]  ;;  %551 = vst [vmem:[%s1353_s1 + $0x140] sm:$0xff] %v550_v52  ;;  %v556_v55 = vld [vmem:[%s1352_s0 + $0x310] sm:$0xff]  ;;  %555 = vst [vmem:[%s1353_s1 + $0x1b0] sm:$0xff] %v554_v54 }
  0x1d   :  { %553 = vst [vmem:[%s1353_s1 + $0x300] sm:$0xff] %v552_v53  ;;  %557 = vst [vmem:[%s1353_s1 + $0x370] sm:$0xff] %v556_v55  ;;  %v560_v57 = vld [vmem:[%s1352_s0 + $0x228] sm:$0xff]  ;;  %v562_v58 = vld [vmem:[%s1352_s0 + $0xd8] sm:$0xff] }
  0x1e   :  { %559 = vst [vmem:[%s1353_s1 + $0x8] sm:$0xff] %v558_v56  ;;  %v564_v59 = vld [vmem:[%s1352_s0 + $0x298] sm:$0xff]  ;;  %561 = vst [vmem:[%s1353_s1 + $0x1c8] sm:$0xff] %v560_v57  ;;  %v566_v60 = vld [vmem:[%s1352_s0 + $0x148] sm:$0xff] }
  0x1f   :  { %563 = vst [vmem:[%s1353_s1 + $0x78] sm:$0xff] %v562_v58  ;;  %565 = vst [vmem:[%s1353_s1 + $0x238] sm:$0xff] %v564_v59  ;;  %v568_v61 = vld [vmem:[%s1352_s0 + $0x308] sm:$0xff]  ;;  %v570_v62 = vld [vmem:[%s1352_s0 + $0x1b8] sm:$0xff] }
  0x20   :  { %567 = vst [vmem:[%s1353_s1 + $0xe8] sm:$0xff] %v566_v60  ;;  %569 = vst [vmem:[%s1353_s1 + $0x2a8] sm:$0xff] %v568_v61  ;;  %v572_v63 = vld [vmem:[%s1352_s0 + $0x378] sm:$0xff]  ;;  %v578_v2 = vld [vmem:[%s1352_s0 + $0xc8] sm:$0xff] }
  0x21   :  { %571 = vst [vmem:[%s1353_s1 + $0x158] sm:$0xff] %v570_v62  ;;  %v574_v0 = vld [vmem:[%s1352_s0 + $0x58] sm:$0xff]  ;;  %573 = vst [vmem:[%s1353_s1 + $0x318] sm:$0xff] %v572_v63  ;;  %v580_v3 = vld [vmem:[%s1352_s0 + $0x288] sm:$0xff] }
  0x22   :  { %v576_v1 = vld [vmem:[%s1352_s0 + $0x218] sm:$0xff]  ;;  %575 = vst [vmem:[%s1353_s1 + $0x18] sm:$0xff] %v574_v0  ;;  %579 = vst [vmem:[%s1353_s1 + $0x88] sm:$0xff] %v578_v2  ;;  %v586_v6 = vld [vmem:[%s1352_s0 + $0x1a8] sm:$0xff] }
  0x23   :  { %577 = vst [vmem:[%s1353_s1 + $0x1d8] sm:$0xff] %v576_v1  ;;  %v582_v4 = vld [vmem:[%s1352_s0 + $0x138] sm:$0xff]  ;;  %581 = vst [vmem:[%s1353_s1 + $0x248] sm:$0xff] %v580_v3  ;;  %v588_v7 = vld [vmem:[%s1352_s0 + $0x368] sm:$0xff] }
  0x24   :  { %583 = vst [vmem:[%s1353_s1 + $0xf8] sm:$0xff] %v582_v4  ;;  %v584_v5 = vld [vmem:[%s1352_s0 + $0x2f8] sm:$0xff]  ;;  %587 = vst [vmem:[%s1353_s1 + $0x168] sm:$0xff] %v586_v6  ;;  %v590_v8 = vld [vmem:[%s1352_s0 + $0x48] sm:$0xff] }
  0x25   :  { %585 = vst [vmem:[%s1353_s1 + $0x2b8] sm:$0xff] %v584_v5  ;;  %589 = vst [vmem:[%s1353_s1 + $0x328] sm:$0xff] %v588_v7  ;;  %v592_v9 = vld [vmem:[%s1352_s0 + $0x208] sm:$0xff]  ;;  %v594_v10 = vld [vmem:[%s1352_s0 + $0xb8] sm:$0xff] }
  0x26   :  { %591 = vst [vmem:[%s1353_s1 + $0x28] sm:$0xff] %v590_v8  ;;  %593 = vst [vmem:[%s1353_s1 + $0x1e8] sm:$0xff] %v592_v9  ;;  %v596_v11 = vld [vmem:[%s1352_s0 + $0x278] sm:$0xff]  ;;  %v598_v12 = vld [vmem:[%s1352_s0 + $0x128] sm:$0xff] }
  0x27   :  { %595 = vst [vmem:[%s1353_s1 + $0x98] sm:$0xff] %v594_v10  ;;  %v600_v13 = vld [vmem:[%s1352_s0 + $0x2e8] sm:$0xff]  ;;  %597 = vst [vmem:[%s1353_s1 + $0x258] sm:$0xff] %v596_v11  ;;  %v602_v14 = vld [vmem:[%s1352_s0 + $0x198] sm:$0xff] }
  0x28   :  { %599 = vst [vmem:[%s1353_s1 + $0x108] sm:$0xff] %v598_v12  ;;  %601 = vst [vmem:[%s1353_s1 + $0x2c8] sm:$0xff] %v600_v13  ;;  %v604_v15 = vld [vmem:[%s1352_s0 + $0x358] sm:$0xff]  ;;  %v610_v18 = vld [vmem:[%s1352_s0 + $0xa8] sm:$0xff] }
  0x29   :  { %v606_v16 = vld [vmem:[%s1352_s0 + $0x38] sm:$0xff]  ;;  %603 = vst [vmem:[%s1353_s1 + $0x178] sm:$0xff] %v602_v14  ;;  %605 = vst [vmem:[%s1353_s1 + $0x338] sm:$0xff] %v604_v15  ;;  %v612_v19 = vld [vmem:[%s1352_s0 + $0x268] sm:$0xff] }
  0x2a   :  { %607 = vst [vmem:[%s1353_s1 + $0x38] sm:$0xff] %v606_v16  ;;  %v608_v17 = vld [vmem:[%s1352_s0 + $0x1f8] sm:$0xff]  ;;  %611 = vst [vmem:[%s1353_s1 + $0xa8] sm:$0xff] %v610_v18  ;;  %v618_v22 = vld [vmem:[%s1352_s0 + $0x188] sm:$0xff] }
  0x2b   :  { %609 = vst [vmem:[%s1353_s1 + $0x1f8] sm:$0xff] %v608_v17  ;;  %613 = vst [vmem:[%s1353_s1 + $0x268] sm:$0xff] %v612_v19  ;;  %v614_v20 = vld [vmem:[%s1352_s0 + $0x118] sm:$0xff]  ;;  %v620_v23 = vld [vmem:[%s1352_s0 + $0x348] sm:$0xff] }
  0x2c   :  { %v616_v21 = vld [vmem:[%s1352_s0 + $0x2d8] sm:$0xff]  ;;  %615 = vst [vmem:[%s1353_s1 + $0x118] sm:$0xff] %v614_v20  ;;  %619 = vst [vmem:[%s1353_s1 + $0x188] sm:$0xff] %v618_v22  ;;  %v622_v24 = vld [vmem:[%s1352_s0 + $0x28] sm:$0xff] }
  0x2d   :  { %617 = vst [vmem:[%s1353_s1 + $0x2d8] sm:$0xff] %v616_v21  ;;  %v624_v25 = vld [vmem:[%s1352_s0 + $0x1e8] sm:$0xff]  ;;  %621 = vst [vmem:[%s1353_s1 + $0x348] sm:$0xff] %v620_v23  ;;  %v626_v26 = vld [vmem:[%s1352_s0 + $0x98] sm:$0xff] }
  0x2e   :  { %623 = vst [vmem:[%s1353_s1 + $0x48] sm:$0xff] %v622_v24  ;;  %625 = vst [vmem:[%s1353_s1 + $0x208] sm:$0xff] %v624_v25  ;;  %v628_v27 = vld [vmem:[%s1352_s0 + $0x258] sm:$0xff]  ;;  %v630_v28 = vld [vmem:[%s1352_s0 + $0x108] sm:$0xff] }
  0x2f   :  { %627 = vst [vmem:[%s1353_s1 + $0xb8] sm:$0xff] %v626_v26  ;;  %629 = vst [vmem:[%s1353_s1 + $0x278] sm:$0xff] %v628_v27  ;;  %v632_v29 = vld [vmem:[%s1352_s0 + $0x2c8] sm:$0xff]  ;;  %v634_v30 = vld [vmem:[%s1352_s0 + $0x178] sm:$0xff] }
  0x30   :  { %631 = vst [vmem:[%s1353_s1 + $0x128] sm:$0xff] %v630_v28  ;;  %v636_v31 = vld [vmem:[%s1352_s0 + $0x338] sm:$0xff]  ;;  %633 = vst [vmem:[%s1353_s1 + $0x2e8] sm:$0xff] %v632_v29  ;;  %v642_v34 = vld [vmem:[%s1352_s0 + $0x88] sm:$0xff] }
  0x31   :  { %635 = vst [vmem:[%s1353_s1 + $0x198] sm:$0xff] %v634_v30  ;;  %637 = vst [vmem:[%s1353_s1 + $0x358] sm:$0xff] %v636_v31  ;;  %v638_v32 = vld [vmem:[%s1352_s0 + $0x18] sm:$0xff]  ;;  %v644_v35 = vld [vmem:[%s1352_s0 + $0x248] sm:$0xff] }
  0x32   :  { %v640_v33 = vld [vmem:[%s1352_s0 + $0x1d8] sm:$0xff]  ;;  %639 = vst [vmem:[%s1353_s1 + $0x58] sm:$0xff] %v638_v32  ;;  %643 = vst [vmem:[%s1353_s1 + $0xc8] sm:$0xff] %v642_v34  ;;  %v650_v38 = vld [vmem:[%s1352_s0 + $0x168] sm:$0xff] }
  0x33   :  { %641 = vst [vmem:[%s1353_s1 + $0x218] sm:$0xff] %v640_v33  ;;  %v646_v36 = vld [vmem:[%s1352_s0 + $0xf8] sm:$0xff]  ;;  %645 = vst [vmem:[%s1353_s1 + $0x288] sm:$0xff] %v644_v35  ;;  %v652_v39 = vld [vmem:[%s1352_s0 + $0x328] sm:$0xff] }
  0x34   :  { %v648_v37 = vld [vmem:[%s1352_s0 + $0x2b8] sm:$0xff]  ;;  %647 = vst [vmem:[%s1353_s1 + $0x138] sm:$0xff] %v646_v36  ;;  %v654_v40 = vld [vmem:[%s1352_s0 + $0x8] sm:$0xff]  ;;  %651 = vst [vmem:[%s1353_s1 + $0x1a8] sm:$0xff] %v650_v38 }
  0x35   :  { %649 = vst [vmem:[%s1353_s1 + $0x2f8] sm:$0xff] %v648_v37  ;;  %653 = vst [vmem:[%s1353_s1 + $0x368] sm:$0xff] %v652_v39  ;;  %v656_v41 = vld [vmem:[%s1352_s0 + $0x1c8] sm:$0xff]  ;;  %v658_v42 = vld [vmem:[%s1352_s0 + $0x78] sm:$0xff] }
  0x36   :  { %655 = vst [vmem:[%s1353_s1 + $0x68] sm:$0xff] %v654_v40  ;;  %v660_v43 = vld [vmem:[%s1352_s0 + $0x238] sm:$0xff]  ;;  %657 = vst [vmem:[%s1353_s1 + $0x228] sm:$0xff] %v656_v41  ;;  %v662_v44 = vld [vmem:[%s1352_s0 + $0xe8] sm:$0xff] }
  0x37   :  { %659 = vst [vmem:[%s1353_s1 + $0xd8] sm:$0xff] %v658_v42  ;;  %661 = vst [vmem:[%s1353_s1 + $0x298] sm:$0xff] %v660_v43  ;;  %v664_v45 = vld [vmem:[%s1352_s0 + $0x2a8] sm:$0xff]  ;;  %v666_v46 = vld [vmem:[%s1352_s0 + $0x158] sm:$0xff] }
  0x38   :  { %663 = vst [vmem:[%s1353_s1 + $0x148] sm:$0xff] %v662_v44  ;;  %665 = vst [vmem:[%s1353_s1 + $0x308] sm:$0xff] %v664_v45  ;;  %v668_v47 = vld [vmem:[%s1352_s0 + $0x318] sm:$0xff] }
  0x39   :  { %667 = vst [vmem:[%s1353_s1 + $0x1b8] sm:$0xff] %v666_v46  ;;  %669 = vst [vmem:[%s1353_s1 + $0x378] sm:$0xff] %v668_v47 }

// kernel: fno3d_layer_forward.3
= control target key start
LH: loop header
LB: loop body
LE: loop exit
PB: predicated region body
PF: predicated region fallthrough
CT: control target
= control target key end

     0   :  { %s1271_s15 = smov 0   ;;  %s1273_s16 = smov 0   ;;  %s1398_s0 = inlined_call_operand.vmem [shape: f32[2,4,4096], index: 0, kind: input, shape index: {}]   ;;  %s1399_s1 = inlined_call_operand.vmem [shape: f32[4,4], index: 1, kind: input, shape index: {}]   ;;  %s1400_s2 = inlined_call_operand.vmem [shape: f32[4,1], index: 2, kind: input, shape index: {}]   ;;  %s1401_s3 = inlined_call_operand.vmem [shape: f32[2,4,4096], index: 3, kind: input, shape index: {}]   ;;  %s1402_s4 = inlined_call_operand.vmem [shape: f32[2,4,4096], index: 4, kind: output, shape index: {}]  }
   0x1   :  { %s1275_s17 = smov 0   ;;  %s1277_s18 = smov 0  }
   0x2   :  { %s1279_s19 = smov 0  }
   0x3 LB: > { %s23_s20 = sadd.s32 1, %s1234_s17  ;;  %s26_s21 = sadd.s32 1, %s1238_s18  ;;  %s1242_s19 = sphi %s1279_s19, %s14_s19   ;;  %s1238_s18 = sphi %s1277_s18, %s1406_s18   ;;  %s1234_s17 = sphi %s1275_s17, %s1405_s17   ;;  %s1230_s16 = sphi %s1273_s16, %s1404_s16   ;;  %s1226_s15 = sphi %s1271_s15, %s1403_s15  }
   0x4   : > { %p24_p0 = scmp.ge.s32.totalorder %s23_s20, 2  ;;  %p1109_p1 = scmp.ge.s32.totalorder %s1242_s19, 1 }
   0x5   : > { %p200_p2 = scmp.lt.s32.totalorder %s1242_s19, 5 }
   0x6   : > { %s1408_s20 = smov (%p24_p0, %s23_s20), 0  ;;  %s1410_s21 = smov (!%p24_p0, %s26_s21), %s1238_s18 }
   0x7   : > { %p201_p3 = pnand %p1109_p1, %p200_p2  ;;  %p28_p4 = scmp.ge.s32.totalorder %s1410_s21, 2 }
   0x8   : > { %s1110_s22 = sshll.u32 (!%p201_p3), %s1226_s15, 4  ;;  %p244_p5 = scmp.lt.s32.totalorder (!%p201_p3), %s1230_s16, 1  ;;  %v1244_v0 = vmov (!%p201_p3), 0.0   ;;  %v282_v1 = vld [vmem:[%s1400_s2] sm:$0xf] (!%p201_p3)  ;;  %v1245_v2 = vmov (!%p201_p3), 0  }
   0x9   : > { %s1412_s21 = smov (%p28_p4, %s1410_s21), 0  ;;  %204 = sbr.rel (%p201_p3) target bundleno = 258 (0x102), region = 36 }
   0xa   : > { %p246_p6 = scmp.lt.s32.totalorder (!%p201_p3), %s1110_s22, 31  ;;  %405 = vmatprep.mubr.f32.mxu0 (!%p201_p3), %v1244_v0  ;;  %476 = vmatprep.mubr.f32.mxu1 (!%p201_p3), %v1244_v0  ;;  %vm308_vm0 = vcmask (!%p201_p3), 1043456   ;;  %v273_v9 = vld [vmem:[%s1399_s1] sm:$0xf] (!%p201_p3)  ;;  %vm304_vm1 = vcmask (!%p201_p3), 31744  }
   0xb   : > { %1187 = vset.pattern.permute.xlu0 (!%p201_p3), %v1245_v2 }
   0xc   : > { %285 = vperm.xlu0 (!%p201_p3), %1187, %v282_v1  }
  0x10   : > { %s1414_s16 = smov (!%p244_p5, %s1230_s16), 1  ;;  %s1416_s22 = smov (!%p246_p6, %s1110_s22), 31 }
  0x11   : > { %s1111_s25 = sshll.u32 %s1414_s16, 5 }
  0x12   : > { %s249_s26 = sadd.s32 %s1111_s25, %s1416_s22 }
  0x13   : > { %s1304_s27 = sshll.u32 %s249_s26, 2 }
  0x14   : > { %s251_s30 = scalar_lea.vmem %s1398_s0, %s1304_s27  ;;  %s1341_s9 = scalar_lea.vmem %s1401_s3, %s1304_s27 }
  0x15   : > { %v274_v3 = vld [vmem:[%s251_s30] sm:$0xff]  ;;  %v275_v4 = vld [vmem:[%s251_s30 + $0x8] sm:$0xff]  ;;  %v276_v5 = vld [vmem:[%s251_s30 + $0x10] sm:$0xff]  ;;  %s1357_s12 = scalar_lea.vmem %s1402_s4, %s1304_s27 }
  0x16   : > { %v296_v6 = vcombine.high %v274_v3, %v274_v3  ;;  %v297_v7 = vcombine.high %v275_v4, %v275_v4  ;;  %v277_v8 = vld [vmem:[%s251_s30 + $0x18] sm:$0xff]  ;;  %v298_v10 = vcombine.high %v276_v5, %v276_v5  ;;  %v278_v12 = vld [vmem:[%s251_s30 + $0x20] sm:$0xff]  ;;  %v279_v13 = vld [vmem:[%s251_s30 + $0x28] sm:$0xff] }
  0x17   : > { %v299_v11 = vcombine.high %v277_v8, %v277_v8  ;;  %v300_v14 = vcombine.high %v278_v12, %v278_v12  ;;  %v301_v15 = vcombine.high %v279_v13, %v279_v13  ;;  %v280_v16 = vld [vmem:[%s251_s30 + $0x30] sm:$0xff]  ;;  %v281_v17 = vld [vmem:[%s251_s30 + $0x38] sm:$0xff]  ;;  %v909_v20 = vld [vmem:[%s1341_s9] sm:$0xff] }
  0x18   : > { %1119 = vmatprep.subr.msk.mxu0 %vm308_vm0, %v296_v6  ;;  %1122 = vmatprep.subr.msk.mxu1 %vm308_vm0, %v297_v7  ;;  %v302_v18 = vcombine.high %v280_v16, %v280_v16  ;;  %v303_v19 = vcombine.high %v281_v17, %v281_v17  ;;  %v910_v21 = vld [vmem:[%s1341_s9 + $0x8] sm:$0xff]  ;;  %v925_v25 = vcombine.high %v909_v20, %v909_v20  ;;  %v911_v31 = vld [vmem:[%s1341_s9 + $0x10] sm:$0xff]  ;;  %v912_v32 = vld [vmem:[%s1341_s9 + $0x18] sm:$0xff] }
  0x19   : > { %1120 = vmatpush1.msk.msra.mxu0 %vm308_vm0, %v274_v3  ;;  %1123 = vmatpush1.msk.msra.mxu1 %vm308_vm0, %v275_v4  ;;  %v926_v26 = vcombine.high %v910_v21, %v910_v21  ;;  %v927_v41 = vcombine.high %v911_v31, %v911_v31  ;;  %v928_v42 = vcombine.high %v912_v32, %v912_v32  ;;  %v913_v47 = vld [vmem:[%s1341_s9 + $0x20] sm:$0xff]  ;;  %v914_v48 = vld [vmem:[%s1341_s9 + $0x28] sm:$0xff]  ;;  %v915_v1 = vld [vmem:[%s1341_s9 + $0x30] sm:$0xff] }
  0x1a   : > { %1121 = vmatmul.mubr.msk.f32.vlgmr.msra.gmra.mrb[0].mxu0 %vm304_vm1, %v273_v9  ;;  %1124 = vmatmul.mubr.msk.f32.vlgmr.msra.gmra.mrb[0].mxu1 %vm304_vm1, %v273_v9  ;;  %v929_v59 = vcombine.high %v913_v47, %v913_v47  ;;  %v930_v60 = vcombine.high %v914_v48, %v914_v48  ;;  %v916_v2 = vld [vmem:[%s1341_s9 + $0x38] sm:$0xff] }
  0x1b   : > { %1125 = vmatprep.subr.msk.mxu0 %vm308_vm0, %v298_v10  ;;  %1128 = vmatprep.subr.msk.mxu1 %vm308_vm0, %v299_v11 }
  0x1c   : > { %1126 = vmatpush1.msk.msra.mxu0 %vm308_vm0, %v276_v5  ;;  %1129 = vmatpush1.msk.msra.mxu1 %vm308_vm0, %v277_v8 }
  0x1d   : > { %547 = vmatprep.mubr.f32.mxu0 %v1244_v0  ;;  %618 = vmatprep.mubr.f32.mxu1 %v1244_v0 }
  0x1e   : > { %1127 = vmatmul.mubr.msk.f32.vlgmr.msra.gmra.mrb[2].mxu0 %vm304_vm1, %v273_v9  ;;  %1130 = vmatmul.mubr.msk.f32.vlgmr.msra.gmra.mrb[2].mxu1 %vm304_vm1, %v273_v9 }
  0x1f   : > { %1131 = vmatprep.subr.msk.mxu0 %vm308_vm0, %v300_v14  ;;  %1134 = vmatprep.subr.msk.mxu1 %vm308_vm0, %v301_v15  ;;  %v932_v14 = vcombine.high %v916_v2, %v916_v2 }
  0x20   : > { %1132 = vmatpush1.msk.msra.mxu0 %vm308_vm0, %v278_v12  ;;  %1135 = vmatpush1.msk.msra.mxu1 %vm308_vm0, %v279_v13  ;;  %v931_v13 = vcombine.high %v915_v1, %v915_v1 }
  0x21   : > { %689 = vmatprep.mubr.f32.mxu0 %v1244_v0  ;;  %760 = vmatprep.mubr.f32.mxu1 %v1244_v0 }
  0x22   : > { %1133 = vmatmul.mubr.msk.f32.vlgmr.msra.gmra.mrb[4].mxu0 %vm304_vm1, %v273_v9  ;;  %1136 = vmatmul.mubr.msk.f32.vlgmr.msra.gmra.mrb[4].mxu1 %vm304_vm1, %v273_v9 }
  0x23   : > { %1137 = vmatprep.subr.msk.mxu0 %vm308_vm0, %v302_v18  ;;  %1140 = vmatprep.subr.msk.mxu1 %vm308_vm0, %v303_v19 }
  0x24   : > { %1138 = vmatpush1.msk.msra.mxu0 %vm308_vm0, %v280_v16  ;;  %1141 = vmatpush1.msk.msra.mxu1 %vm308_vm0, %v281_v17 }
  0x25   : > { %831 = vmatprep.mubr.f32.mxu0 %v1244_v0  ;;  %902 = vmatprep.mubr.f32.mxu1 %v1244_v0 }
  0x26   : > { %1139 = vmatmul.mubr.msk.f32.vlgmr.msra.gmra.mrb[6].mxu0 %vm304_vm1, %v273_v9  ;;  %1142 = vmatmul.mubr.msk.f32.vlgmr.msra.gmra.mrb[6].mxu1 %vm304_vm1, %v273_v9 }
  0x8b   : > { %v1345_v22 = vpop.permute.xlu0 %285 }
  0xed   : > { %v407_v23 = vpop.f32.mrb[0].mxu0  ;;  %v478_v24 = vpop.f32.mrb[0].mxu1 }
  0xee   : > { %v408_v27 = vadd.f32 %v407_v23, %v1345_v22  ;;  %v409_v28 = vpop.f32.mrb[1].mxu0  ;;  %v479_v29 = vadd.f32 %v478_v24, %v1345_v22  ;;  %v480_v30 = vpop.f32.mrb[1].mxu1 }
  0xef   : > { %v410_v33 = vadd.f32 %v409_v28, %v1345_v22  ;;  %v481_v34 = vadd.f32 %v480_v30, %v1345_v22 }
  0xf0   : > { %v941_v35 = vadd.f32 %v909_v20, %v408_v27  ;;  %v943_v36 = vadd.f32 %v910_v21, %v479_v29 }
  0xf1   : > { %v942_v37 = vadd.f32 %v925_v25, %v410_v33  ;;  %v944_v38 = vadd.f32 %v926_v26, %v481_v34  ;;  %v549_v39 = vpop.f32.mrb[2].mxu0  ;;  %v620_v40 = vpop.f32.mrb[2].mxu1 }
  0xf2   : > { %v550_v43 = vadd.f32 %v549_v39, %v1345_v22  ;;  %v621_v44 = vadd.f32 %v620_v40, %v1345_v22  ;;  %v551_v45 = vpop.f32.mrb[3].mxu0  ;;  %v622_v46 = vpop.f32.mrb[3].mxu1 }
  0xf3   : > { %v973_v49 = vcombine.low %v941_v35, %v942_v37  ;;  %v974_v50 = vcombine.low %v943_v36, %v944_v38  ;;  %v552_v51 = vadd.f32 %v551_v45, %v1345_v22  ;;  %v623_v52 = vadd.f32 %v622_v46, %v1345_v22 }
  0xf4   : > { %v945_v53 = vadd.f32 %v911_v31, %v550_v43  ;;  %v947_v54 = vadd.f32 %v912_v32, %v621_v44 }
  0xf5   : > { %989 = vst [vmem:[%s1357_s12] sm:$0xff] %v973_v49  ;;  %990 = vst [vmem:[%s1357_s12 + $0x8] sm:$0xff] %v974_v50  ;;  %v946_v55 = vadd.f32 %v927_v41, %v552_v51  ;;  %v948_v56 = vadd.f32 %v928_v42, %v623_v52  ;;  %v691_v57 = vpop.f32.mrb[4].mxu0  ;;  %v762_v58 = vpop.f32.mrb[4].mxu1 }
  0xf6   : > { %v692_v61 = vadd.f32 %v691_v57, %v1345_v22  ;;  %v763_v62 = vadd.f32 %v762_v58, %v1345_v22  ;;  %v693_v63 = vpop.f32.mrb[5].mxu0  ;;  %v764_v0 = vpop.f32.mrb[5].mxu1 }
  0xf7   : > { %v975_v3 = vcombine.low %v945_v53, %v946_v55  ;;  %v976_v4 = vcombine.low %v947_v54, %v948_v56  ;;  %v694_v5 = vadd.f32 %v693_v63, %v1345_v22  ;;  %v765_v6 = vadd.f32 %v764_v0, %v1345_v22 }
  0xf8   : > { %v949_v7 = vadd.f32 %v913_v47, %v692_v61  ;;  %v951_v8 = vadd.f32 %v914_v48, %v763_v62 }
  0xf9   : > { %991 = vst [vmem:[%s1357_s12 + $0x10] sm:$0xff] %v975_v3  ;;  %992 = vst [vmem:[%s1357_s12 + $0x18] sm:$0xff] %v976_v4  ;;  %v950_v9 = vadd.f32 %v929_v59, %v694_v5  ;;  %v952_v10 = vadd.f32 %v930_v60, %v765_v6  ;;  %v833_v11 = vpop.f32.mrb[6].mxu0  ;;  %v904_v12 = vpop.f32.mrb[6].mxu1 }
  0xfa   : > { %v834_v15 = vadd.f32 %v833_v11, %v1345_v22  ;;  %v905_v16 = vadd.f32 %v904_v12, %v1345_v22  ;;  %v835_v17 = vpop.f32.mrb[7].mxu0  ;;  %v906_v18 = vpop.f32.mrb[7].mxu1 }
  0xfb   : > { %v977_v19 = vcombine.low %v949_v7, %v950_v9  ;;  %v978_v20 = vcombine.low %v951_v8, %v952_v10  ;;  %v836_v21 = vadd.f32 %v835_v17, %v1345_v22  ;;  %v907_v23 = vadd.f32 %v906_v18, %v1345_v22 }
  0xfc   : > { %v953_v24 = vadd.f32 %v915_v1, %v834_v15  ;;  %v955_v25 = vadd.f32 %v916_v2, %v905_v16 }
  0xfd   : > { %993 = vst [vmem:[%s1357_s12 + $0x20] sm:$0xff] %v977_v19  ;;  %994 = vst [vmem:[%s1357_s12 + $0x28] sm:$0xff] %v978_v20  ;;  %v954_v26 = vadd.f32 %v931_v13, %v836_v21  ;;  %v956_v27 = vadd.f32 %v932_v14, %v907_v23 }
  0xff   : > { %v979_v28 = vcombine.low %v953_v24, %v954_v26  ;;  %v980_v29 = vcombine.low %v955_v25, %v956_v27 }
 0x101   : > { %995 = vst [vmem:[%s1357_s12 + $0x30] sm:$0xff] %v979_v28  ;;  %996 = vst [vmem:[%s1357_s12 + $0x38] sm:$0xff] %v980_v29 }
 0x102 PF: > { %s14_s19 = sadd.s32 1, %s1242_s19   ;;  %s1403_s15 = smov %s1234_s17 }
 0x103   : > { %p11_p7 = scmp.ge.s32.totalorder %s14_s19, 6   ;;  %s1404_s16 = smov %s1238_s18 }
 0x104   : > { %s1405_s17 = smov %s1408_s20  ;;  %s1406_s18 = smov %s1412_s21 }
 0x105   :  { %13 = sbr.rel (!%p11_p7) target bundleno = 3 (0x3), region = 69 }

</bundles_post_ra>
